<compile_context>
chip_gen: v5e
topology: v5e:2x2
jax: 0.10.0
libtpu: 0.0.40
codegen_flags: <defaults>
</compile_context>

<pallas_src>
import functools

import jax
import jax.numpy as jnp
import numpy as np
from jax.experimental import pallas as pl
from jax.experimental.pallas import tpu as pltpu


def resblock_kernel(x_ref, w1_ref, b1_ref, w2_ref, b2_ref, out_ref, col_ref,
                    *, W, HW):
    """ResBlock forward on a lane-stacked block of NB images.

    x_ref  : (C, L)       L = NB*H*W; lane axis = images stacked spatially
    w1_ref : (Cmid, 9*C)  3x3 conv weights; column = (ky*3+kx)*C + c
    b1_ref : (Cmid, 1)
    w2_ref : (Cout, Cmid) 1x1 conv weights
    b2_ref : (Cout, 1)
    out_ref: (C, L)
    col_ref: (9*C, L)     VMEM im2col scratch
    """
    C, L = x_ref.shape

    x = x_ref[...]
    h = jnp.maximum(x, 0.0)                       # relu(x)

    # Per-position validity masks; periodic per image along the stacked axis,
    # so rolled values that wrap across image seams are always masked out.
    p = jax.lax.broadcasted_iota(jnp.int32, (1, L), 1)
    p_img = p % HW                                # position within its image
    col_w = p_img % W                             # column within its row
    not_top = p_img >= W                          # row above exists  (dy=-1)
    not_bot = p_img < (HW - W)                    # row below exists  (dy=+1)
    not_left = col_w >= 1                         # col left exists   (dx=-1)
    not_right = col_w <= W - 2                    # col right exists  (dx=+1)

    # Build the (9*C, L) im2col stack: tap k = (dy+1)*3 + (dx+1) occupies rows
    # [k*C, (k+1)*C).  Each tap is a lane roll (XLU) of relu(x) plus a boolean
    # mask zeroing contributions whose true 2-D neighbour is outside the image.
    k = 0
    for dy in (-1, 0, 1):
        for dx in (-1, 0, 1):
            s = dy * W + dx                       # flat neighbour offset
            t = h if s == 0 else pltpu.roll(h, shift=(-s) % L, axis=1)
            m = None
            if dy == -1:
                m = not_top
            elif dy == 1:
                m = not_bot
            if dx == -1:
                m = not_left if m is None else jnp.logical_and(m, not_left)
            elif dx == 1:
                m = not_right if m is None else jnp.logical_and(m, not_right)
            if m is not None:
                t = jnp.where(m, t, 0.0)
            col_ref[k * C:(k + 1) * C, :] = t
            k += 1

    # conv1 (3x3) as one fused K = 9*C matmul, then bias + relu.
    y = jnp.dot(w1_ref[...], col_ref[...], preferred_element_type=jnp.float32)
    y = jnp.maximum(y + b1_ref[...], 0.0)
    # conv2 (1x1) + bias, residual add, lane-dense store.
    z = jnp.dot(w2_ref[...], y, preferred_element_type=jnp.float32) + b2_ref[...]
    out_ref[...] = (x + z).astype(out_ref.dtype)


def _pick_block_n(N, HW, cap=128):
    """Images per grid step: largest divisor of N not exceeding `cap`.

    No >=2-steps constraint (the grid is a serial loop on single-TC chips).
    If a multi-step block would give a lane extent not divisible by 128, fall
    back to a single full-batch block (BlockSpec last-dim constraint)."""
    if N <= cap:
        return N
    if HW % 128 != 0:
        return N
    nb = 1
    for d in range(1, cap + 1):
        if N % d == 0:
            nb = d
    return nb


def resblock_forward(x_nchw, w1_oihw, b1, w2_oihw, b2):
    """x: (N, C, H, W) f32; w1: (Cmid, C, 3, 3); w2: (Cout, Cmid, 1, 1)."""
    N, C, H, W = x_nchw.shape
    Cmid = w1_oihw.shape[0]
    Cout = w2_oihw.shape[0]
    assert w1_oihw.shape[1] == C and w1_oihw.shape[2:] == (3, 3)
    assert Cout == C, "residual add requires out_channels == in_channels"
    HW = H * W
    NB = _pick_block_n(N, HW)
    L = NB * HW

    # Channel-major, lane-stacked layout (thin XLA layout pass outside kernel).
    x_cm = jnp.transpose(x_nchw, (1, 0, 2, 3)).reshape(C, N * HW)
    # (O, I, ky, kx) -> (O, ky, kx, I) -> (O, 9*I); column = (ky*3+kx)*C + c.
    w1_stack = jnp.transpose(w1_oihw, (0, 2, 3, 1)).reshape(Cmid, 9 * C)
    w2_flat = w2_oihw.reshape(Cout, Cmid)
    b1_col = b1.reshape(Cmid, 1)
    b2_col = b2.reshape(Cout, 1)

    kernel = functools.partial(resblock_kernel, W=W, HW=HW)
    out_cm = pl.pallas_call(
        kernel,
        out_shape=jax.ShapeDtypeStruct((C, N * HW), x_nchw.dtype),
        grid_spec=pltpu.PrefetchScalarGridSpec(
            num_scalar_prefetch=0,
            grid=(N // NB,),
            in_specs=[
                pl.BlockSpec((C, L), lambda i: (0, i)),
                pl.BlockSpec((Cmid, 9 * C), lambda i: (0, 0)),
                pl.BlockSpec((Cmid, 1), lambda i: (0, 0)),
                pl.BlockSpec((Cout, Cmid), lambda i: (0, 0)),
                pl.BlockSpec((Cout, 1), lambda i: (0, 0)),
            ],
            out_specs=pl.BlockSpec((C, L), lambda i: (0, i)),
            scratch_shapes=[pltpu.VMEM((9 * C, L), jnp.float32)],
        ),
        compiler_params=pltpu.CompilerParams(
            dimension_semantics=("parallel",)),
    )(x_cm, w1_stack, b1_col, w2_flat, b2_col)
    return jnp.transpose(out_cm.reshape(C, N, H, W), (1, 0, 2, 3))


def reference_forward(x, w1, b1, w2, b2):
    """Pure-JAX NCHW/OIHW reference (matches the PyTorch module semantics)."""
    h = jax.nn.relu(x)
    h = jax.lax.conv_general_dilated(
        h, w1, window_strides=(1, 1), padding=((1, 1), (1, 1)),
        dimension_numbers=("NCHW", "OIHW", "NCHW")) + b1.reshape(1, -1, 1, 1)
    h = jax.nn.relu(h)
    h = jax.lax.conv_general_dilated(
        h, w2, window_strides=(1, 1), padding=((0, 0), (0, 0)),
        dimension_numbers=("NCHW", "OIHW", "NCHW")) + b2.reshape(1, -1, 1, 1)
    return x + h


if __name__ == "__main__":
    # ResBlock(in_channels=4, out_channels=4) -> mid_channels=4, bn=False.
    # TODO(synk): bn=True variant (BatchNorm2d inserted after conv1) not implemented.
    N, C, H, W = 2, 4, 16, 16
    Cmid, Cout = C, C

    key = jax.random.PRNGKey(0)
    kx, kw1, kb1, kw2, kb2 = jax.random.split(key, 5)

    x = jax.random.normal(kx, (N, C, H, W), dtype=jnp.float32)
    w1 = jax.random.normal(kw1, (Cmid, C, 3, 3), dtype=jnp.float32) * 0.1
    b1 = jax.random.normal(kb1, (Cmid,), dtype=jnp.float32) * 0.1
    w2 = jax.random.normal(kw2, (Cout, Cmid, 1, 1), dtype=jnp.float32) * 0.1
    b2 = jax.random.normal(kb2, (Cout,), dtype=jnp.float32) * 0.1

    out = jax.block_until_ready(resblock_forward(x, w1, b1, w2, b2))
    ref = jax.block_until_ready(reference_forward(x, w1, b1, w2, b2))

    if not np.allclose(np.asarray(out), np.asarray(ref), atol=5e-4, rtol=5e-4):
        err = float(np.max(np.abs(np.asarray(out) - np.asarray(ref))))
        raise AssertionError(
            f"Pallas ResBlock does not match reference (max abs err {err:.3e})")

    print("KERNEL_OK")
</pallas_src>

<mosaic_0001>
module attributes {stable_mosaic.version = 11 : i64} {
  func.func @resblock_kernel(%arg0: i32, %arg1: memref<4x512xf32, #tpu.memory_space<vmem>>, %arg2: memref<4x36xf32, #tpu.memory_space<vmem>>, %arg3: memref<4x1xf32, #tpu.memory_space<vmem>>, %arg4: memref<4x4xf32, #tpu.memory_space<vmem>>, %arg5: memref<4x1xf32, #tpu.memory_space<vmem>>, %arg6: memref<4x512xf32, #tpu.memory_space<vmem>>, %arg7: memref<36x512xf32, #tpu.memory_space<vmem>>) attributes {dimension_semantics = [#tpu.dimension_semantics<parallel>], iteration_bounds = array<i64: 1>, scalar_prefetch = 0 : i64, scratch_operands = 1 : i64, tpu.core_type = #tpu.core_type<tc>, window_params = [{transform_indices = @transform_0, window_bounds = array<i64: 4, 512>}, {pipeline_mode = #tpu.pipeline_mode<synchronous>, transform_indices = @transform_1, window_bounds = array<i64: 4, 36>}, {pipeline_mode = #tpu.pipeline_mode<synchronous>, transform_indices = @transform_2, window_bounds = array<i64: 4, 1>}, {pipeline_mode = #tpu.pipeline_mode<synchronous>, transform_indices = @transform_3, window_bounds = array<i64: 4, 4>}, {pipeline_mode = #tpu.pipeline_mode<synchronous>, transform_indices = @transform_4, window_bounds = array<i64: 4, 1>}, {transform_indices = @transform_5, window_bounds = array<i64: 4, 512>}]} {
    %c0 = arith.constant 0 : index
    %c0_0 = arith.constant 0 : index
    %0 = vector.load %arg1[%c0, %c0_0] : memref<4x512xf32, #tpu.memory_space<vmem>>, vector<4x512xf32>
    %cst = arith.constant 0.000000e+00 : f32
    %1 = vector.broadcast %cst : f32 to vector<4x512xf32>
    %2 = arith.maximumf %0, %1 : vector<4x512xf32>
    %3 = tpu.iota {dimensions = array<i32: 1>} : vector<1x512xi32>
    %c256_i32 = arith.constant 256 : i32
    %c0_i32 = arith.constant 0 : i32
    %4 = arith.cmpi eq, %c256_i32, %c0_i32 : i32
    %c1_i32 = arith.constant 1 : i32
    %5 = arith.select %4, %c1_i32, %c256_i32 : i32
    %6 = vector.broadcast %5 : i32 to vector<1x512xi32>
    %7 = arith.remsi %3, %6 : vector<1x512xi32>
    %c0_i32_1 = arith.constant 0 : i32
    %8 = vector.broadcast %c0_i32_1 : i32 to vector<1x512xi32>
    %9 = arith.cmpi ne, %7, %8 : vector<1x512xi32>
    %c0_i32_2 = arith.constant 0 : i32
    %10 = vector.broadcast %c0_i32_2 : i32 to vector<1x512xi32>
    %11 = arith.cmpi slt, %7, %10 : vector<1x512xi32>
    %c0_i32_3 = arith.constant 0 : i32
    %12 = arith.cmpi slt, %5, %c0_i32_3 : i32
    %13 = vector.broadcast %12 : i1 to vector<1x512xi1>
    %14 = vector.broadcast %13 : vector<1x512xi1> to vector<1x512xi1>
    %15 = arith.xori %11, %14 : vector<1x512xi1>
    %16 = arith.andi %15, %9 : vector<1x512xi1>
    %17 = vector.broadcast %5 : i32 to vector<1x512xi32>
    %18 = arith.addi %7, %17 : vector<1x512xi32>
    %19 = arith.select %16, %18, %7 : vector<1x512xi1>, vector<1x512xi32>
    %c16_i32 = arith.constant 16 : i32
    %c0_i32_4 = arith.constant 0 : i32
    %20 = arith.cmpi eq, %c16_i32, %c0_i32_4 : i32
    %c1_i32_5 = arith.constant 1 : i32
    %21 = arith.select %20, %c1_i32_5, %c16_i32 : i32
    %22 = vector.broadcast %21 : i32 to vector<1x512xi32>
    %23 = arith.remsi %19, %22 : vector<1x512xi32>
    %c0_i32_6 = arith.constant 0 : i32
    %24 = vector.broadcast %c0_i32_6 : i32 to vector<1x512xi32>
    %25 = arith.cmpi ne, %23, %24 : vector<1x512xi32>
    %c0_i32_7 = arith.constant 0 : i32
    %26 = vector.broadcast %c0_i32_7 : i32 to vector<1x512xi32>
    %27 = arith.cmpi slt, %23, %26 : vector<1x512xi32>
    %c0_i32_8 = arith.constant 0 : i32
    %28 = arith.cmpi slt, %21, %c0_i32_8 : i32
    %29 = vector.broadcast %28 : i1 to vector<1x512xi1>
    %30 = vector.broadcast %29 : vector<1x512xi1> to vector<1x512xi1>
    %31 = arith.xori %27, %30 : vector<1x512xi1>
    %32 = arith.andi %31, %25 : vector<1x512xi1>
    %33 = vector.broadcast %21 : i32 to vector<1x512xi32>
    %34 = arith.addi %23, %33 : vector<1x512xi32>
    %35 = arith.select %32, %34, %23 : vector<1x512xi1>, vector<1x512xi32>
    %c16_i32_9 = arith.constant 16 : i32
    %36 = vector.broadcast %c16_i32_9 : i32 to vector<1x512xi32>
    %37 = arith.cmpi sge, %19, %36 : vector<1x512xi32>
    %c240_i32 = arith.constant 240 : i32
    %38 = vector.broadcast %c240_i32 : i32 to vector<1x512xi32>
    %39 = arith.cmpi slt, %19, %38 : vector<1x512xi32>
    %c1_i32_10 = arith.constant 1 : i32
    %40 = vector.broadcast %c1_i32_10 : i32 to vector<1x512xi32>
    %41 = arith.cmpi sge, %35, %40 : vector<1x512xi32>
    %c14_i32 = arith.constant 14 : i32
    %42 = vector.broadcast %c14_i32 : i32 to vector<1x512xi32>
    %43 = arith.cmpi sle, %35, %42 : vector<1x512xi32>
    %c17_i32 = arith.constant 17 : i32
    %44 = tpu.dynamic_rotate %2 by %c17_i32 dim 1 : vector<4x512xf32>, i32 -> vector<4x512xf32>
    %45 = arith.andi %37, %41 : vector<1x512xi1>
    %cst_11 = arith.constant 0.000000e+00 : f32
    %46 = vector.shape_cast %45 : vector<1x512xi1> to vector<1x512xi1>
    %47 = vector.broadcast %46 : vector<1x512xi1> to vector<4x512xi1>
    %48 = vector.broadcast %cst_11 : f32 to vector<4x512xf32>
    %49 = arith.select %47, %44, %48 : vector<4x512xi1>, vector<4x512xf32>
    %c0_12 = arith.constant 0 : index
    %c0_13 = arith.constant 0 : index
    %50 = vector.load %arg7[%c0_12, %c0_13] : memref<36x512xf32, #tpu.memory_space<vmem>>, vector<4x512xf32>
    tpu.vector_store %arg7[%c0_12, %c0_13], %49 {strides = array<i32>} : memref<36x512xf32, #tpu.memory_space<vmem>>, vector<4x512xf32>,
    %c16_i32_14 = arith.constant 16 : i32
    %51 = tpu.dynamic_rotate %2 by %c16_i32_14 dim 1 : vector<4x512xf32>, i32 -> vector<4x512xf32>
    %cst_15 = arith.constant 0.000000e+00 : f32
    %52 = vector.shape_cast %37 : vector<1x512xi1> to vector<1x512xi1>
    %53 = vector.broadcast %52 : vector<1x512xi1> to vector<4x512xi1>
    %54 = vector.broadcast %cst_15 : f32 to vector<4x512xf32>
    %55 = arith.select %53, %51, %54 : vector<4x512xi1>, vector<4x512xf32>
    %c4 = arith.constant 4 : index
    %c0_16 = arith.constant 0 : index
    %56 = vector.load %arg7[%c4, %c0_16] : memref<36x512xf32, #tpu.memory_space<vmem>>, vector<4x512xf32>
    tpu.vector_store %arg7[%c4, %c0_16], %55 {strides = array<i32>} : memref<36x512xf32, #tpu.memory_space<vmem>>, vector<4x512xf32>,
    %c15_i32 = arith.constant 15 : i32
    %57 = tpu.dynamic_rotate %2 by %c15_i32 dim 1 : vector<4x512xf32>, i32 -> vector<4x512xf32>
    %58 = arith.andi %37, %43 : vector<1x512xi1>
    %cst_17 = arith.constant 0.000000e+00 : f32
    %59 = vector.shape_cast %58 : vector<1x512xi1> to vector<1x512xi1>
    %60 = vector.broadcast %59 : vector<1x512xi1> to vector<4x512xi1>
    %61 = vector.broadcast %cst_17 : f32 to vector<4x512xf32>
    %62 = arith.select %60, %57, %61 : vector<4x512xi1>, vector<4x512xf32>
    %c8 = arith.constant 8 : index
    %c0_18 = arith.constant 0 : index
    %63 = vector.load %arg7[%c8, %c0_18] : memref<36x512xf32, #tpu.memory_space<vmem>>, vector<4x512xf32>
    tpu.vector_store %arg7[%c8, %c0_18], %62 {strides = array<i32>} : memref<36x512xf32, #tpu.memory_space<vmem>>, vector<4x512xf32>,
    %c1_i32_19 = arith.constant 1 : i32
    %64 = tpu.dynamic_rotate %2 by %c1_i32_19 dim 1 : vector<4x512xf32>, i32 -> vector<4x512xf32>
    %cst_20 = arith.constant 0.000000e+00 : f32
    %65 = vector.shape_cast %41 : vector<1x512xi1> to vector<1x512xi1>
    %66 = vector.broadcast %65 : vector<1x512xi1> to vector<4x512xi1>
    %67 = vector.broadcast %cst_20 : f32 to vector<4x512xf32>
    %68 = arith.select %66, %64, %67 : vector<4x512xi1>, vector<4x512xf32>
    %c12 = arith.constant 12 : index
    %c0_21 = arith.constant 0 : index
    %69 = vector.load %arg7[%c12, %c0_21] : memref<36x512xf32, #tpu.memory_space<vmem>>, vector<4x512xf32>
    tpu.vector_store %arg7[%c12, %c0_21], %68 {strides = array<i32>} : memref<36x512xf32, #tpu.memory_space<vmem>>, vector<4x512xf32>,
    %c16 = arith.constant 16 : index
    %c0_22 = arith.constant 0 : index
    %70 = vector.load %arg7[%c16, %c0_22] : memref<36x512xf32, #tpu.memory_space<vmem>>, vector<4x512xf32>
    tpu.vector_store %arg7[%c16, %c0_22], %2 {strides = array<i32>} : memref<36x512xf32, #tpu.memory_space<vmem>>, vector<4x512xf32>,
    %c511_i32 = arith.constant 511 : i32
    %71 = tpu.dynamic_rotate %2 by %c511_i32 dim 1 : vector<4x512xf32>, i32 -> vector<4x512xf32>
    %cst_23 = arith.constant 0.000000e+00 : f32
    %72 = vector.shape_cast %43 : vector<1x512xi1> to vector<1x512xi1>
    %73 = vector.broadcast %72 : vector<1x512xi1> to vector<4x512xi1>
    %74 = vector.broadcast %cst_23 : f32 to vector<4x512xf32>
    %75 = arith.select %73, %71, %74 : vector<4x512xi1>, vector<4x512xf32>
    %c20 = arith.constant 20 : index
    %c0_24 = arith.constant 0 : index
    %76 = vector.load %arg7[%c20, %c0_24] : memref<36x512xf32, #tpu.memory_space<vmem>>, vector<4x512xf32>
    tpu.vector_store %arg7[%c20, %c0_24], %75 {strides = array<i32>} : memref<36x512xf32, #tpu.memory_space<vmem>>, vector<4x512xf32>,
    %c497_i32 = arith.constant 497 : i32
    %77 = tpu.dynamic_rotate %2 by %c497_i32 dim 1 : vector<4x512xf32>, i32 -> vector<4x512xf32>
    %78 = arith.andi %39, %41 : vector<1x512xi1>
    %cst_25 = arith.constant 0.000000e+00 : f32
    %79 = vector.shape_cast %78 : vector<1x512xi1> to vector<1x512xi1>
    %80 = vector.broadcast %79 : vector<1x512xi1> to vector<4x512xi1>
    %81 = vector.broadcast %cst_25 : f32 to vector<4x512xf32>
    %82 = arith.select %80, %77, %81 : vector<4x512xi1>, vector<4x512xf32>
    %c24 = arith.constant 24 : index
    %c0_26 = arith.constant 0 : index
    %83 = vector.load %arg7[%c24, %c0_26] : memref<36x512xf32, #tpu.memory_space<vmem>>, vector<4x512xf32>
    tpu.vector_store %arg7[%c24, %c0_26], %82 {strides = array<i32>} : memref<36x512xf32, #tpu.memory_space<vmem>>, vector<4x512xf32>,
    %c496_i32 = arith.constant 496 : i32
    %84 = tpu.dynamic_rotate %2 by %c496_i32 dim 1 : vector<4x512xf32>, i32 -> vector<4x512xf32>
    %cst_27 = arith.constant 0.000000e+00 : f32
    %85 = vector.shape_cast %39 : vector<1x512xi1> to vector<1x512xi1>
    %86 = vector.broadcast %85 : vector<1x512xi1> to vector<4x512xi1>
    %87 = vector.broadcast %cst_27 : f32 to vector<4x512xf32>
    %88 = arith.select %86, %84, %87 : vector<4x512xi1>, vector<4x512xf32>
    %c28 = arith.constant 28 : index
    %c0_28 = arith.constant 0 : index
    %89 = vector.load %arg7[%c28, %c0_28] : memref<36x512xf32, #tpu.memory_space<vmem>>, vector<4x512xf32>
    tpu.vector_store %arg7[%c28, %c0_28], %88 {strides = array<i32>} : memref<36x512xf32, #tpu.memory_space<vmem>>, vector<4x512xf32>,
    %c495_i32 = arith.constant 495 : i32
    %90 = tpu.dynamic_rotate %2 by %c495_i32 dim 1 : vector<4x512xf32>, i32 -> vector<4x512xf32>
    %91 = arith.andi %39, %43 : vector<1x512xi1>
    %cst_29 = arith.constant 0.000000e+00 : f32
    %92 = vector.shape_cast %91 : vector<1x512xi1> to vector<1x512xi1>
    %93 = vector.broadcast %92 : vector<1x512xi1> to vector<4x512xi1>
    %94 = vector.broadcast %cst_29 : f32 to vector<4x512xf32>
    %95 = arith.select %93, %90, %94 : vector<4x512xi1>, vector<4x512xf32>
    %c32 = arith.constant 32 : index
    %c0_30 = arith.constant 0 : index
    %96 = vector.load %arg7[%c32, %c0_30] : memref<36x512xf32, #tpu.memory_space<vmem>>, vector<4x512xf32>
    tpu.vector_store %arg7[%c32, %c0_30], %95 {strides = array<i32>} : memref<36x512xf32, #tpu.memory_space<vmem>>, vector<4x512xf32>,
    %c0_31 = arith.constant 0 : index
    %c0_32 = arith.constant 0 : index
    %97 = vector.load %arg2[%c0_31, %c0_32] : memref<4x36xf32, #tpu.memory_space<vmem>>, vector<4x36xf32>
    %c0_33 = arith.constant 0 : index
    %c0_34 = arith.constant 0 : index
    %98 = vector.load %arg7[%c0_33, %c0_34] : memref<36x512xf32, #tpu.memory_space<vmem>>, vector<36x512xf32>
    %cst_35 = arith.constant dense<0.000000e+00> : vector<4x512xf32>
    %99 = tpu.matmul %97, %98, %cst_35 {dimension_numbers = #tpu.dot_dimension_numbers<[1], [0], [0], [1], [0, 0, 1, 1], [], []>} : vector<4x36xf32>, vector<36x512xf32>, vector<4x512xf32> -> vector<4x512xf32>
    %c0_36 = arith.constant 0 : index
    %c0_37 = arith.constant 0 : index
    %100 = vector.load %arg3[%c0_36, %c0_37] : memref<4x1xf32, #tpu.memory_space<vmem>>, vector<4x1xf32>
    %101 = vector.broadcast %100 : vector<4x1xf32> to vector<4x512xf32>
    %102 = arith.addf %99, %101 : vector<4x512xf32>
    %cst_38 = arith.constant 0.000000e+00 : f32
    %103 = vector.broadcast %cst_38 : f32 to vector<4x512xf32>
    %104 = arith.maximumf %102, %103 : vector<4x512xf32>
    %c0_39 = arith.constant 0 : index
    %c0_40 = arith.constant 0 : index
    %105 = vector.load %arg4[%c0_39, %c0_40] : memref<4x4xf32, #tpu.memory_space<vmem>>, vector<4x4xf32>
    %cst_41 = arith.constant dense<0.000000e+00> : vector<4x512xf32>
    %106 = tpu.matmul %105, %104, %cst_41 {dimension_numbers = #tpu.dot_dimension_numbers<[1], [0], [0], [1], [0, 0, 1, 1], [], []>} : vector<4x4xf32>, vector<4x512xf32>, vector<4x512xf32> -> vector<4x512xf32>
    %c0_42 = arith.constant 0 : index
    %c0_43 = arith.constant 0 : index
    %107 = vector.load %arg5[%c0_42, %c0_43] : memref<4x1xf32, #tpu.memory_space<vmem>>, vector<4x1xf32>
    %108 = vector.broadcast %107 : vector<4x1xf32> to vector<4x512xf32>
    %109 = arith.addf %106, %108 : vector<4x512xf32>
    %110 = arith.addf %0, %109 : vector<4x512xf32>
    %c0_44 = arith.constant 0 : index
    %c0_45 = arith.constant 0 : index
    %111 = vector.load %arg6[%c0_44, %c0_45] : memref<4x512xf32, #tpu.memory_space<vmem>>, vector<4x512xf32>
    tpu.vector_store %arg6[%c0_44, %c0_45], %110 {strides = array<i32>} : memref<4x512xf32, #tpu.memory_space<vmem>>, vector<4x512xf32>,
    return
  }
  func.func @transform_0(%arg0: i32) -> (i32, i32) {
    %c0_i32 = arith.constant 0 : i32
    %c0_i32_0 = arith.constant 0 : i32
    return %c0_i32, %arg0 : i32, i32
  }
  func.func @transform_1(%arg0: i32) -> (i32, i32) {
    %c0_i32 = arith.constant 0 : i32
    %c0_i32_0 = arith.constant 0 : i32
    %c0_i32_1 = arith.constant 0 : i32
    return %c0_i32, %c0_i32_0 : i32, i32
  }
  func.func @transform_2(%arg0: i32) -> (i32, i32) {
    %c0_i32 = arith.constant 0 : i32
    %c0_i32_0 = arith.constant 0 : i32
    %c0_i32_1 = arith.constant 0 : i32
    return %c0_i32, %c0_i32_0 : i32, i32
  }
  func.func @transform_3(%arg0: i32) -> (i32, i32) {
    %c0_i32 = arith.constant 0 : i32
    %c0_i32_0 = arith.constant 0 : i32
    %c0_i32_1 = arith.constant 0 : i32
    return %c0_i32, %c0_i32_0 : i32, i32
  }
  func.func @transform_4(%arg0: i32) -> (i32, i32) {
    %c0_i32 = arith.constant 0 : i32
    %c0_i32_0 = arith.constant 0 : i32
    %c0_i32_1 = arith.constant 0 : i32
    return %c0_i32, %c0_i32_0 : i32, i32
  }
  func.func @transform_5(%arg0: i32) -> (i32, i32) {
    %c0_i32 = arith.constant 0 : i32
    %c0_i32_0 = arith.constant 0 : i32
    return %c0_i32, %arg0 : i32, i32
  }
}

</mosaic_0001>

<bundles_post_ra>
// kernel: tpu_custom_call.1
= control target key start
LH: loop header
LB: loop body
LE: loop exit
PB: predicated region body
PF: predicated region fallthrough
CT: control target
= control target key end

     0   :  { %10 = vsyncpa [#allocation4], 0  ;;  %s1280_s0 = inlined_call_operand.hbm [shape: f32[4,512], index: 0, kind: input, shape index: {}]   ;;  %s1281_s1 = inlined_call_operand.vmem [shape: f32[4,36], index: 1, kind: input, shape index: {}]   ;;  %s1282_s2 = inlined_call_operand.vmem [shape: f32[4,1], index: 2, kind: input, shape index: {}]   ;;  %s1283_s3 = inlined_call_operand.vmem [shape: f32[4,4], index: 3, kind: input, shape index: {}]   ;;  %s1284_s4 = inlined_call_operand.vmem [shape: f32[4,1], index: 4, kind: input, shape index: {}]   ;;  %s1285_s5 = inlined_call_operand.hbm [shape: f32[4,512], index: 5, kind: output, shape index: {}]  }
   0x1   :  { %11 = vsyncpa [#allocation5], 0  ;;  %s17_s20 = sshll.u32 %s1280_s0, 4  ;;  %s900_s21 = smov [#allocation3]   ;;  %s18_s20 = int_to_ptr.hbm [resolvable:$true] %s17_s20 }
   0x2   :  { %s19_s22 = sshll.u32 %s900_s21, 4  ;;  %s20_s22 = int_to_ptr.vmem [resolvable:$true] %s19_s22 }
   0x3   :  { %22 = dma.hbm_to_vmem [thread:$0]  %s18_s20, 256, %s20_s22, [#allocation4]  }
   0x4   :  { %896 = dma.done.wait [#allocation4], 256  }
   0x5   :  { %897 = vsyncadd [#allocation4], 4294967040  ;;  %v944_v0 = vld [vmem:[#allocation3 + $0x8] sm:$0xff]  ;;  %v946_v1 = vld [vmem:[#allocation3] sm:$0xff]  ;;  %s901_s0 = smov 17   ;;  %s902_s23 = smov 16   ;;  %v39_v40 = vlaneseq }
   0x6   :  { %v949_v2 = vmax.f32 %v944_v0, 0.0  ;;  %v952_v3 = vmax.f32 %v946_v1, 0.0  ;;  %s903_s24 = smov 15   ;;  %s904_s25 = smov 1  }
   0x7   :  { %s905_s26 = smov 127   ;;  %s906_s27 = smov 113   ;;  %v999_v42 = vand.u32 127, %v39_v40 }
   0x8   :  { %160 = vst [vmem:[#allocation1 + $0x10] ss:$2 sm:$0xff] %v949_v2  ;;  %s907_s28 = smov 112   ;;  %s908_s29 = smov 111  }
   0x9   :  { %158 = vst [vmem:[#allocation1] ss:$2 sm:$0xff] %v952_v3  ;;  %v42_v44 = vadd.s32 256, %v999_v42  ;;  %v1005_v45 = vadd.s32 384, %v999_v42  ;;  %vm177_vm2 = vcmp.lt.s32.totalorder %v999_v42, 17  ;;  %vm221_vm5 = vcmp.lt.s32.totalorder %v999_v42, 16 }
   0xa   :  { %vm273_vm7 = vcmp.lt.s32.totalorder %v999_v42, 15  ;;  %vm317_vm10 = vcmp.lt.s32.totalorder %v999_v42, 1  ;;  %vm384_vm11 = vcmp.lt.s32.totalorder %v999_v42, 127  ;;  %vm436_vm14 = vcmp.lt.s32.totalorder %v999_v42, 113  ;;  %s809_s13 = sshll.u32 %s1285_s5, 4  ;;  %s810_s13 = int_to_ptr.hbm [resolvable:$true] %s809_s13 }
   0xb   :  { %v62_v46 = vand.u32 255, %v42_v44  ;;  %v69_v47 = vand.u32 255, %v1005_v45 }
   0xd   :  { %v1012_v49 = vand.u32 15, %v62_v46  ;;  %v1016_v50 = vand.u32 15, %v69_v47  ;;  %vm1018_vm0 = vcmp.ge.s32.totalorder %v62_v46, 16  ;;  %vm1103_vm12 = vcmp.lt.s32.totalorder %v69_v47, 240 }
   0xf   :  { %v164_v4 = vld.sshfl [vmem:[#allocation1 + $0x18] sm:$0xff pattern:$0x75316420]  ;;  %v163_v5 = vld.sshfl [vmem:[#allocation1 + $0x10] sm:$0xff pattern:$0x75316420] }
  0x10   :  { %175 = vrot.lane.b32.xlu2 %v164_v4, %s901_s0  ;;  %173 = vrot.lane.b32.xlu1 %v163_v5, %s901_s0  ;;  %204 = vst [vmem:[#allocation1 + $0x10] ss:$2 sm:$0xff] %v949_v2  ;;  %v162_v6 = vld.sshfl [vmem:[#allocation1 + $0x8] sm:$0xff pattern:$0x75316420]  ;;  %vm150_vm1 = vcmp.ge.s32.totalorder %v1012_v49, 1 }
  0x11   :  { %v959_v7 = vld.sshfl [vmem:[#allocation1] sm:$0xff pattern:$0x75316420]  ;;  %vm151_vm3 = vcmp.ge.s32.totalorder %v1016_v50, 1  ;;  %vm184_vm4 = vmand %vm1018_vm0, %vm150_vm1  ;;  %vm154_vm6 = vcmp.le.s32.totalorder %v1012_v49, 14  ;;  %vm155_vm9 = vcmp.le.s32.totalorder %v1016_v50, 14 }
  0x12   :  { %202 = vst [vmem:[#allocation1] ss:$2 sm:$0xff] %v952_v3  ;;  %vm280_vm8 = vmand %vm1018_vm0, %vm154_vm6  ;;  %v909_v49 = vmov 0  }
  0x13   :  { %vm444_vm15 = vmand %vm1103_vm12, %vm151_vm3  ;;  %846 = vset.pattern.permute.xlu2 %v909_v49  ;;  %847 = vset.pattern.permute.xlu0 %v909_v49 }
  0x17   :  { %v208_v8 = vld.sshfl [vmem:[#allocation1 + $0x18] sm:$0xff pattern:$0x75316420]  ;;  %v207_v9 = vld.sshfl [vmem:[#allocation1 + $0x10] sm:$0xff pattern:$0x75316420] }
  0x18   :  { %219 = vrot.lane.b32.xlu0 %v208_v8, %s902_s23  ;;  %171 = vrot.lane.b32.xlu2 %v162_v6, %s901_s0  ;;  %256 = vst [vmem:[#allocation1 + $0x10] ss:$2 sm:$0xff] %v949_v2 }
  0x19   :  { %v206_v10 = vld.sshfl [vmem:[#allocation1 + $0x8] sm:$0xff pattern:$0x75316420]  ;;  %v965_v11 = vld.sshfl [vmem:[#allocation1] sm:$0xff pattern:$0x75316420] }
  0x1a   :  { %254 = vst [vmem:[#allocation1] ss:$2 sm:$0xff] %v952_v3 }
  0x1f   :  { %v259_v12 = vld.sshfl [vmem:[#allocation1 + $0x10] sm:$0xff pattern:$0x75316420]  ;;  %v260_v13 = vld.sshfl [vmem:[#allocation1 + $0x18] sm:$0xff pattern:$0x75316420] }
  0x20   :  { %215 = vrot.lane.b32.xlu0 %v206_v10, %s902_s23  ;;  %300 = vst [vmem:[#allocation1 + $0x10] ss:$2 sm:$0xff] %v949_v2  ;;  %217 = vrot.lane.b32.xlu2 %v207_v9, %s902_s23 }
  0x21   :  { %v258_v14 = vld.sshfl [vmem:[#allocation1 + $0x8] sm:$0xff pattern:$0x75316420]  ;;  %v971_v15 = vld.sshfl [vmem:[#allocation1] sm:$0xff pattern:$0x75316420] }
  0x22   :  { %267 = vrot.lane.b32.xlu1 %v258_v14, %s903_s24  ;;  %298 = vst [vmem:[#allocation1] ss:$2 sm:$0xff] %v952_v3 }
  0x27   :  { %v303_v16 = vld.sshfl [vmem:[#allocation1 + $0x10] sm:$0xff pattern:$0x75316420]  ;;  %v304_v17 = vld.sshfl [vmem:[#allocation1 + $0x18] sm:$0xff pattern:$0x75316420] }
  0x28   :  { %269 = vrot.lane.b32.xlu2 %v259_v12, %s903_s24  ;;  %271 = vrot.lane.b32.xlu0 %v260_v13, %s903_s24  ;;  %352 = vst [vmem:[#allocation1 + $0x10] ss:$2 sm:$0xff] %v949_v2 }
  0x29   :  { %v301_v18 = vld.sshfl [vmem:[#allocation1] sm:$0xff pattern:$0x75316420]  ;;  %v302_v19 = vld.sshfl [vmem:[#allocation1 + $0x8] sm:$0xff pattern:$0x75316420] }
  0x2a   :  { %313 = vrot.lane.b32.xlu1 %v303_v16, %s904_s25  ;;  %350 = vst [vmem:[#allocation1] ss:$2 sm:$0xff] %v952_v3 }
  0x2f   :  { %v355_v20 = vld.sshfl [vmem:[#allocation1 + $0x10] sm:$0xff pattern:$0x75316420]  ;;  %v356_v23 = vld.sshfl [vmem:[#allocation1 + $0x18] sm:$0xff pattern:$0x75316420] }
  0x30   :  { %315 = vrot.lane.b32.xlu2 %v304_v17, %s904_s25  ;;  %363 = vst [vmem:[#allocation2 + $0x28] sm:$0xf] %v355_v20 }
  0x31   :  { %v353_v21 = vld.sshfl [vmem:[#allocation1] sm:$0xff pattern:$0x75316420]  ;;  %v354_v22 = vld.sshfl [vmem:[#allocation1 + $0x8] sm:$0xff pattern:$0x75316420] }
  0x32   :  { %311 = vrot.lane.b32.xlu1 %v302_v19, %s904_s25  ;;  %361 = vst [vmem:[#allocation2 + $0x8] sm:$0xf] %v353_v21 }
  0x33   :  { %362 = vst [vmem:[#allocation2 + $0x88] sm:$0xf] %v354_v22 }
  0x34   :  { %365 = vst [vmem:[#allocation1] ss:$2 sm:$0xff] %v952_v3 }
  0x35   :  { %364 = vst [vmem:[#allocation2 + $0x40] sm:$0xf] %v356_v23  ;;  %v1087_v23 = vadd.s32 128, %v999_v42 }
  0x36   :  { %367 = vst [vmem:[#allocation1 + $0x10] ss:$2 sm:$0xff] %v949_v2 }
  0x3b   :  { %v368_v24 = vld.sshfl [vmem:[#allocation1] sm:$0xff pattern:$0x75316420]  ;;  %v369_v25 = vld.sshfl [vmem:[#allocation1 + $0x8] sm:$0xff pattern:$0x75316420] }
  0x3c   :  { %376 = vrot.lane.b32.xlu2 %v368_v24, %s905_s26  ;;  %417 = vst [vmem:[#allocation1] ss:$2 sm:$0xff] %v952_v3  ;;  %v55_v24 = vand.u32 255, %v1087_v23 }
  0x3d   :  { %v370_v26 = vld.sshfl [vmem:[#allocation1 + $0x10] sm:$0xff pattern:$0x75316420]  ;;  %v371_v27 = vld.sshfl [vmem:[#allocation1 + $0x18] sm:$0xff pattern:$0x75316420] }
  0x3e   :  { %380 = vrot.lane.b32.xlu0 %v370_v26, %s905_s26  ;;  %419 = vst [vmem:[#allocation1 + $0x10] ss:$2 sm:$0xff] %v949_v2 }
  0x43   :  { %v420_v28 = vld.sshfl [vmem:[#allocation1] sm:$0xff pattern:$0x75316420]  ;;  %v421_v29 = vld.sshfl [vmem:[#allocation1 + $0x8] sm:$0xff pattern:$0x75316420] }
  0x44   :  { %461 = vst [vmem:[#allocation1] ss:$2 sm:$0xff] %v952_v3  ;;  %382 = vrot.lane.b32.xlu2 %v371_v27, %s905_s26 }
  0x45   :  { %v423_v30 = vld.sshfl [vmem:[#allocation1 + $0x18] sm:$0xff pattern:$0x75316420]  ;;  %v422_v31 = vld.sshfl [vmem:[#allocation1 + $0x10] sm:$0xff pattern:$0x75316420] }
  0x46   :  { %434 = vrot.lane.b32.xlu1 %v423_v30, %s906_s27  ;;  %428 = vrot.lane.b32.xlu0 %v420_v28, %s906_s27  ;;  %463 = vst [vmem:[#allocation1 + $0x10] ss:$2 sm:$0xff] %v949_v2  ;;  %v48_v28 = vand.u32 255, %v999_v42 }
  0x4b   :  { %v465_v32 = vld.sshfl [vmem:[#allocation1 + $0x8] sm:$0xff pattern:$0x75316420]  ;;  %v464_v33 = vld.sshfl [vmem:[#allocation1] sm:$0xff pattern:$0x75316420] }
  0x4c   :  { %513 = vst [vmem:[#allocation1] ss:$2 sm:$0xff] %v952_v3 }
  0x4d   :  { %v466_v34 = vld.sshfl [vmem:[#allocation1 + $0x10] sm:$0xff pattern:$0x75316420]  ;;  %v467_v35 = vld.sshfl [vmem:[#allocation1 + $0x18] sm:$0xff pattern:$0x75316420] }
  0x4e   :  { %432 = vrot.lane.b32.xlu1 %v422_v31, %s906_s27  ;;  %515 = vst [vmem:[#allocation1 + $0x10] ss:$2 sm:$0xff] %v949_v2  ;;  %472 = vrot.lane.b32.xlu0 %v464_v33, %s907_s28  ;;  %v1097_v31 = vand.u32 15, %v55_v24 }
  0x50   :  { %vm153_vm13 = vcmp.le.s32.totalorder %v1097_v31, 14 }
  0x53   :  { %v516_v36 = vld.sshfl [vmem:[#allocation1] sm:$0xff pattern:$0x75316420]  ;;  %v517_v41 = vld.sshfl [vmem:[#allocation1 + $0x8] sm:$0xff pattern:$0x75316420] }
  0x55   :  { %v518_v37 = vld.sshfl [vmem:[#allocation1 + $0x10] sm:$0xff pattern:$0x75316420]  ;;  %v519_v38 = vld.sshfl [vmem:[#allocation1 + $0x18] sm:$0xff pattern:$0x75316420] }
  0x56   :  { %528 = vrot.lane.b32.xlu2 %v518_v37, %s908_s29  ;;  %478 = vrot.lane.b32.xlu0 %v467_v35, %s907_s28 }
  0x57   :  { %524 = vrot.lane.b32.xlu1 %v516_v36, %s908_s29 }
  0x5e   :  { %378 = vrot.lane.b32.xlu2 %v369_v25, %s905_s26  ;;  %476 = vrot.lane.b32.xlu0 %v466_v34, %s907_s28 }
  0x5f   :  { %530 = vrot.lane.b32.xlu1 %v519_v38, %s908_s29 }
  0x66   :  { %265 = vrot.lane.b32.xlu2 %v971_v15, %s903_s24  ;;  %474 = vrot.lane.b32.xlu0 %v465_v32, %s907_s28  ;;  %v1099_v32 = vand.u32 15, %v48_v28 }
  0x67   :  { %309 = vrot.lane.b32.xlu1 %v301_v18, %s904_s25 }
  0x6a   :  { %v997_v39 = vpop.permute.xlu2 %175 }
  0x6e   :  { %430 = vrot.lane.b32.xlu0 %v421_v29, %s906_s27 }
  0x6f   :  { %526 = vrot.lane.b32.xlu1 %v517_v41, %s908_s29 }
  0x72   :  { %v1001_v43 = vpop.permute.xlu2 %171 }
  0x76   :  { %213 = vrot.lane.b32.xlu0 %v965_v11, %s902_s23 }
  0x77   :  { %169 = vrot.lane.b32.xlu1 %v959_v7, %s901_s0 }
  0x7a   :  { %v218_v48 = vpop.permute.xlu2 %217 }
  0x82   :  { %v174_v52 = vpop.permute.xlu1 %173  ;;  %v270_v53 = vpop.permute.xlu2 %269 }
  0x83   :  { %v178_v54 = vsel %vm177_vm2, %v174_v52, %v997_v39  ;;  %v179_v55 = vsel %vm177_vm2, %v1001_v43, %v174_v52 }
  0x84   :  { %v196_v56 = vsel %vm184_vm4, %v179_v55, 0.0  ;;  %v197_v57 = vsel %vm151_vm3, %v178_v54, 0.0 }
  0x85   :  { %200 = vst [vmem:[#allocation2 + $0x50] sm:$0xf] %v196_v56 }
  0x86   :  { %201 = vst [vmem:[#allocation2 + $0x18] sm:$0xf] %v197_v57 }
  0x8a   :  { %v1038_v58 = vpop.permute.xlu0 %219  ;;  %v1043_v61 = vpop.permute.xlu2 %315 }
  0x8b   :  { %v222_v59 = vsel %vm221_vm5, %v218_v48, %v1038_v58 }
  0x8c   :  { %v245_v60 = vrot.slane %v222_v59, 4 }
  0x8e   :  { %253 = vst [vmem:[#allocation2 + $0x18] sm:$0xf0] %v245_v60 }
  0x92   :  { %v1046_v62 = vpop.permute.xlu0 %215 }
  0x93   :  { %v223_v63 = vsel %vm221_vm5, %v1046_v62, %v218_v48 }
  0x94   :  { %v236_v2 = vsel %vm1018_vm0, %v223_v63, 0.0  ;;  %v1058_v3 = vpop.permute.xlu1 %267  ;;  %vm152_vm0 = vcmp.le.s32.totalorder %v1099_v32, 14 }
  0x95   :  { %v244_v4 = vrot.slane %v236_v2, 4  ;;  %v275_v5 = vsel %vm273_vm7, %v1058_v3, %v270_v53 }
  0x96   :  { %v292_v6 = vsel %vm280_vm8, %v275_v5, 0.0  ;;  %v377_v7 = vpop.permute.xlu2 %376  ;;  %vm480_vm8 = vcmp.lt.s32.totalorder %v999_v42, 112 }
  0x97   :  { %252 = vst [vmem:[#allocation2 + $0x50] sm:$0xf0] %v244_v4 }
  0x98   :  { %296 = vst [vmem:[#allocation2 + $0x78] sm:$0xf] %v292_v6 }
  0x9a   :  { %v272_v8 = vpop.permute.xlu0 %271 }
  0x9b   :  { %v274_v9 = vsel %vm273_vm7, %v270_v53, %v272_v8 }
  0x9c   :  { %v314_v10 = vpop.permute.xlu1 %313  ;;  %v293_v11 = vsel %vm155_vm9, %v274_v9, 0.0 }
  0x9d   :  { %v318_v12 = vsel %vm317_vm10, %v314_v10, %v1043_v61  ;;  %297 = vst [vmem:[#allocation2 + $0x80] sm:$0xf] %v293_v11 }
  0x9e   :  { %v333_v13 = vsel %vm151_vm3, %v318_v12, 0.0  ;;  %v383_v14 = vpop.permute.xlu2 %382  ;;  %vm1127_vm3 = vcmp.ge.s32.totalorder %v48_v28, 16 }
  0x9f   :  { %v341_v15 = vrot.slane %v333_v13, 4  ;;  %v388_v16 = vsel %vm384_vm11, %v383_v14, %v377_v7  ;;  %vm278_vm4 = vmand %vm1127_vm3, %vm152_vm0 }
  0xa0   :  { %v400_v17 = vsel %vm155_vm9, %v388_v16, 0.0 }
  0xa1   :  { %349 = vst [vmem:[#allocation2 + $0x80] sm:$0xf0] %v341_v15  ;;  %v408_v18 = vrot.slane %v400_v17, 4 }
  0xa3   :  { %416 = vst [vmem:[#allocation2 + $0x40] sm:$0xf0] %v408_v18 }
  0xa4   :  { %v1079_v19 = vpop.permute.xlu1 %311 }
  0xa5   :  { %v319_v20 = vsel %vm317_vm10, %v1079_v19, %v314_v10 }
  0xa6   :  { %v332_v21 = vsel %vm150_vm1, %v319_v20, 0.0 }
  0xa7   :  { %v340_v22 = vrot.slane %v332_v21, 4 }
  0xa9   :  { %348 = vst [vmem:[#allocation2 + $0x78] sm:$0xf0] %v340_v22 }
  0xb0   :  { %v381_v25 = vpop.permute.xlu0 %380  ;;  %v1090_v26 = vpop.permute.xlu2 %528 }
  0xb1   :  { %v385_v27 = vsel %vm384_vm11, %v381_v25, %v383_v14  ;;  %v578_v14 = vld [vmem:[%s1282_s2] sm:$0xf] }
  0xb2   :  { %v399_v29 = vsel %vm154_vm6, %v385_v27, 0.0  ;;  %581 = vperm.xlu2 %846, %v578_v14  }
  0xb3   :  { %v407_v30 = vrot.slane %v399_v29, 4 }
  0xb5   :  { %415 = vst [vmem:[#allocation2 + $0x28] sm:$0xf0] %v407_v30 }
  0xb8   :  { %v435_v34 = vpop.permute.xlu1 %434  ;;  %v379_v35 = vpop.permute.xlu2 %378 }
  0xb9   :  { %v386_v36 = vsel %vm384_vm11, %v379_v35, %v381_v25  ;;  %v387_v37 = vsel %vm384_vm11, %v377_v7, %v379_v35  ;;  %v1118_v38 = vpop.permute.xlu0 %428  ;;  %vm148_vm11 = vcmp.ge.s32.totalorder %v1099_v32, 1 }
  0xba   :  { %v397_v40 = vsel %vm152_vm0, %v387_v37, 0.0  ;;  %v398_v41 = vsel %vm153_vm13, %v386_v36, 0.0  ;;  %v440_v44 = vsel %vm436_vm14, %v435_v34, %v1118_v38  ;;  %v569_v36 = vld [vmem:[#allocation2 + $0x40] sm:$0xff] }
  0xbb   :  { %v405_v45 = vrot.slane %v397_v40, 4  ;;  %v406_v46 = vrot.slane %v398_v41, 4  ;;  %v456_v47 = vsel %vm444_vm15, %v440_v44, 0.0  ;;  %vm588_vm15 = vcmask 1043456  }
  0xbc   :  { %460 = vst [vmem:[#allocation2 + $0x60] sm:$0xf] %v456_v47 }
  0xbd   :  { %413 = vst [vmem:[#allocation2 + $0x8] sm:$0xf0] %v405_v45 }
  0xbe   :  { %414 = vst [vmem:[#allocation2 + $0x88] sm:$0xf0] %v406_v46 }
  0xc0   :  { %v1135_v51 = vpop.permute.xlu1 %432  ;;  %v266_v52 = vpop.permute.xlu2 %265 }
  0xc1   :  { %v437_v53 = vsel %vm436_vm14, %v1135_v51, %v435_v34  ;;  %v276_v54 = vsel %vm273_vm7, %v266_v52, %v1058_v3  ;;  %v277_v55 = vsel %vm273_vm7, %v272_v8, %v266_v52  ;;  %v473_v56 = vpop.permute.xlu0 %472  ;;  %vm540_vm7 = vmand %vm1103_vm12, %vm155_vm9  ;;  %vm1171_vm9 = vcmp.lt.s32.totalorder %v55_v24, 240  ;;  %v568_v34 = vld [vmem:[#allocation2 + $0x28] sm:$0xff]  ;;  %v564_v52 = vld [vmem:[#allocation2 + $0x78] sm:$0xff] }
  0xc2   :  { %v455_v57 = vsel %vm150_vm1, %v437_v53, 0.0  ;;  %v290_v59 = vsel %vm278_vm4, %v277_v55, 0.0  ;;  %v291_v60 = vsel %vm153_vm13, %v276_v54, 0.0  ;;  %vm532_vm1 = vcmp.lt.s32.totalorder %v999_v42, 111  ;;  %v560_v55 = vld [vmem:[#allocation2 + $0x50] sm:$0xff] }
  0xc3   :  { %459 = vst [vmem:[#allocation2 + $0x98] sm:$0xf] %v455_v57  ;;  %v561_v57 = vld [vmem:[#allocation2 + $0x18] sm:$0xff] }
  0xc4   :  { %294 = vst [vmem:[#allocation2 + $0x30] sm:$0xf] %v290_v59  ;;  %v566_v48 = vld [vmem:[#allocation2 + $0x8] sm:$0xff] }
  0xc5   :  { %295 = vst [vmem:[#allocation2 + $0x68] sm:$0xf] %v291_v60 }
  0xc9   :  { %v479_v63 = vpop.permute.xlu0 %478  ;;  %v1150_v2 = vpop.permute.xlu1 %524 }
  0xca   :  { %v484_v3 = vsel %vm480_vm8, %v479_v63, %v473_v56 }
  0xcb   :  { %v496_v4 = vsel %vm1103_vm12, %v484_v3, 0.0  ;;  %vm149_vm12 = vcmp.ge.s32.totalorder %v1097_v31, 1 }
  0xcc   :  { %v504_v5 = vrot.slane %v496_v4, 4 }
  0xce   :  { %512 = vst [vmem:[#allocation2 + $0x60] sm:$0xf0] %v504_v5 }
  0xd1   :  { %v477_v6 = vpop.permute.xlu0 %476  ;;  %v531_v7 = vpop.permute.xlu1 %530 }
  0xd2   :  { %v481_v8 = vsel %vm480_vm8, %v477_v6, %v479_v63  ;;  %v533_v9 = vsel %vm532_vm1, %v1090_v26, %v531_v7  ;;  %v536_v10 = vsel %vm532_vm1, %v531_v7, %v1150_v2 }
  0xd3   :  { %v503_v11 = vrot.slane %v481_v8, 4  ;;  %v551_v50 = vsel %vm154_vm6, %v533_v9, 0.0  ;;  %v552_v12 = vsel %vm540_vm7, %v536_v10, 0.0  ;;  %vm1202_vm6 = vmand %vm1171_vm9, %vm149_vm12  ;;  %v567_v8 = vld [vmem:[#allocation2 + $0x88] sm:$0xff] }
  0xd4   :  { %555 = vst [vmem:[#allocation2 + $0x70] sm:$0xf] %v551_v50  ;;  %v686_v50 = vld [vmem:[%s1284_s4] sm:$0xf] }
  0xd5   :  { %511 = vst [vmem:[#allocation2 + $0x98] sm:$0xf0] %v503_v11  ;;  %v573_v33 = vld [vmem:[#allocation2 + $0x60] sm:$0xff]  ;;  %689 = vperm.xlu0 %847, %v686_v50  }
  0xd6   :  { %556 = vst [vmem:[#allocation2 + $0x90] sm:$0xf] %v552_v12 }
  0xd9   :  { %v475_v15 = vpop.permute.xlu0 %474  ;;  %v310_v16 = vpop.permute.xlu1 %309 }
  0xda   :  { %v482_v17 = vsel %vm480_vm8, %v475_v15, %v477_v6  ;;  %v483_v18 = vsel %vm480_vm8, %v473_v56, %v475_v15  ;;  %v320_v20 = vsel %vm317_vm10, %v310_v16, %v1079_v19  ;;  %v321_v21 = vsel %vm317_vm10, %v1043_v61, %v310_v16  ;;  %vm1210_vm10 = vmand %vm1171_vm9, %vm153_vm13  ;;  %v557_v56 = vld [vmem:[%s1281_s1] sm:$0xf] }
  0xdb   :  { %v494_v22 = vsel %vm1171_vm9, %v482_v17, 0.0  ;;  %v501_v23 = vrot.slane %v483_v18, 4  ;;  %v330_v24 = vsel %vm148_vm11, %v321_v21, 0.0  ;;  %v331_v25 = vsel %vm149_vm12, %v320_v20, 0.0  ;;  %v576_v27 = vld [vmem:[#allocation2 + $0x70] sm:$0xf] }
  0xdc   :  { %v502_v28 = vrot.slane %v494_v22, 4  ;;  %v338_v29 = vrot.slane %v330_v24, 4  ;;  %v339_v30 = vrot.slane %v331_v25, 4  ;;  %823 = vmatpush.msk.msra.mxu2 %vm588_vm15, %v576_v27  ;;  %v572_v19 = vld [vmem:[#allocation2 + $0x98] sm:$0xff]  ;;  %vm584_vm13 = vcmask 293888  }
  0xdd   :  { %509 = vst [vmem:[#allocation2 + $0x58] sm:$0xf0] %v501_v23  ;;  %v577_v61 = vld [vmem:[#allocation2 + $0x90] sm:$0xf]  ;;  %v685_v18 = vld [vmem:[%s1283_s3] sm:$0xf] }
  0xde   :  { %510 = vst [vmem:[#allocation2 + $0x10] sm:$0xf0] %v502_v28  ;;  %825 = vmatpush.msk.msra.mxu3 %vm588_vm15, %v577_v61  ;;  %653 = vmatpush.msra.mxu2 %v572_v19  ;;  %s910_s3 = smov [#allocation6]  }
  0xdf   :  { %346 = vst [vmem:[#allocation2 + $0x30] sm:$0xf0] %v338_v29  ;;  %s807_s4 = sshll.u32 %s910_s3, 4  ;;  %s808_s4 = int_to_ptr.vmem [resolvable:$true] %s807_s4 }
  0xe0   :  { %347 = vst [vmem:[#allocation2 + $0x68] sm:$0xf0] %v339_v30  ;;  %673 = vmatpush.msra.mxu3 %v573_v33  ;;  %654 = vmatpush.msra.mxu2 %v568_v34 }
  0xe1   :  { %v431_v37 = vpop.permute.xlu0 %430  ;;  %v527_v41 = vpop.permute.xlu1 %526 }
  0xe2   :  { %674 = vmatpush.msra.mxu3 %v569_v36  ;;  %v438_v44 = vsel %vm436_vm14, %v431_v37, %v1135_v51  ;;  %v439_v45 = vsel %vm436_vm14, %v1118_v38, %v431_v37  ;;  %v534_v46 = vsel %vm532_vm1, %v527_v41, %v1090_v26  ;;  %v535_v47 = vsel %vm532_vm1, %v1150_v2, %v527_v41  ;;  %v565_v38 = vld [vmem:[#allocation2 + $0x80] sm:$0xff]  ;;  %vm182_vm14 = vmand %vm1127_vm3, %vm148_vm11 }
  0xe3   :  { %v453_v53 = vsel %vm148_vm11, %v439_v45, 0.0  ;;  %v454_v54 = vsel %vm1202_vm6, %v438_v44, 0.0  ;;  %v549_v51 = vsel %vm152_vm0, %v535_v47, 0.0  ;;  %655 = vmatpush.msra.mxu2 %v564_v52  ;;  %v550_v26 = vsel %vm1210_vm10, %v534_v46, 0.0 }
  0xe4   :  { %457 = vst [vmem:[#allocation2 + $0x58] sm:$0xf] %v453_v53  ;;  %675 = vmatpush.msra.mxu3 %v565_v38 }
  0xe5   :  { %458 = vst [vmem:[#allocation2 + $0x10] sm:$0xf] %v454_v54  ;;  %656 = vmatpush.msra.mxu2 %v560_v55 }
  0xe6   :  { %553 = vst [vmem:[#allocation2 + $0x20] sm:$0xf] %v549_v51  ;;  %676 = vmatpush.msra.mxu3 %v561_v57  ;;  %824 = vmatmul.msk.f32.vlgmr.msra.gmra.mxu2 %vm584_vm13, %v557_v56  ;;  %v562_v31 = vld [vmem:[#allocation2 + $0x30] sm:$0xff] }
  0xe7   :  { %554 = vst [vmem:[#allocation2 + $0x48] sm:$0xf] %v550_v26  ;;  %826 = vmatmul.msk.f32.vlgmr.msra.gmra.mxu3 %vm584_vm13, %v557_v56  ;;  %v563_v9 = vld [vmem:[#allocation2 + $0x68] sm:$0xff] }
  0xe9   :  { %v214_v59 = vpop.permute.xlu0 %213  ;;  %v170_v60 = vpop.permute.xlu1 %169 }
  0xea   :  { %v224_v63 = vsel %vm221_vm5, %v214_v59, %v1046_v62  ;;  %v225_v2 = vsel %vm221_vm5, %v1038_v58, %v214_v59  ;;  %v180_v3 = vsel %vm177_vm2, %v170_v60, %v1001_v43  ;;  %v181_v32 = vsel %vm177_vm2, %v997_v39, %v170_v60 }
  0xeb   :  { %v234_v4 = vsel %vm1127_vm3, %v225_v2, 0.0  ;;  %v243_v5 = vrot.slane %v224_v63, 4  ;;  %v194_v6 = vsel %vm182_vm14, %v181_v32, 0.0  ;;  %v195_v62 = vsel %vm149_vm12, %v180_v3, 0.0  ;;  %v570_v39 = vld [vmem:[#allocation2 + $0x58] sm:$0xff] }
  0xec   :  { %v242_v7 = vrot.slane %v234_v4, 4  ;;  %198 = vst [vmem:[#allocation2] sm:$0xf] %v194_v6  ;;  %v571_v42 = vld [vmem:[#allocation2 + $0x10] sm:$0xff]  ;;  %vm692_vm2 = vcmask 31744  }
  0xed   :  { %251 = vst [vmem:[#allocation2 + $0x38] sm:$0xf0] %v243_v5  ;;  %v574_v58 = vld [vmem:[#allocation2 + $0x20] sm:$0xf] }
  0xee   :  { %250 = vst [vmem:[#allocation2] sm:$0xf0] %v242_v7  ;;  %819 = vmatpush.msk.msra.mxu0 %vm588_vm15, %v574_v58  ;;  %v575_v43 = vld [vmem:[#allocation2 + $0x48] sm:$0xf] }
  0xef   :  { %199 = vst [vmem:[#allocation2 + $0x38] sm:$0xf] %v195_v62  ;;  %821 = vmatpush.msk.msra.mxu1 %vm588_vm15, %v575_v43 }
  0xf0   :  { %613 = vmatpush.msra.mxu0 %v570_v39 }
  0xf1   :  { %633 = vmatpush.msra.mxu1 %v571_v42 }
  0xf2   :  { %614 = vmatpush.msra.mxu0 %v566_v48 }
  0xf3   :  { %634 = vmatpush.msra.mxu1 %v567_v8 }
  0xf4   :  { %615 = vmatpush.msra.mxu0 %v562_v31 }
  0xf5   :  { %635 = vmatpush.msra.mxu1 %v563_v9  ;;  %v558_v10 = vld [vmem:[#allocation2] sm:$0xff] }
  0xf6   :  { %v559_v11 = vld [vmem:[#allocation2 + $0x38] sm:$0xff]  ;;  %616 = vmatpush.msra.mxu0 %v558_v10 }
  0xf7   :  { %636 = vmatpush.msra.mxu1 %v559_v11  ;;  %820 = vmatmul.msk.f32.vlgmr.msra.gmra.mxu0 %vm584_vm13, %v557_v56 }
  0xf8   :  { %822 = vmatmul.msk.f32.vlgmr.msra.gmra.mxu1 %vm584_vm13, %v557_v56 }
 0x10c   :  { %v582_v12 = vpop.permute.xlu2 %581 }
 0x147   :  { %v690_v27 = vpop.permute.xlu0 %689 }
 0x169   :  { %v658_v13 = vpop.f32.mrf.mxu2 }
 0x16a   :  { %v659_v14 = vadd.f32 %v658_v13, %v582_v12  ;;  %v678_v15 = vpop.f32.mrf.mxu3 }
 0x16b   :  { %v679_v16 = vadd.f32 %v678_v15, %v582_v12 }
 0x16c   :  { %v683_v49 = vmax.f32 %v659_v14, 0.0 }
 0x16d   :  { %v684_v17 = vmax.f32 %v679_v16, 0.0 }
 0x16e   :  { %831 = vmatpush.msk.msrb.mxu2 %vm588_vm15, %v683_v49 }
 0x16f   :  { %833 = vmatpush.msk.msrb.mxu3 %vm588_vm15, %v684_v17  ;;  %832 = vmatmul.msk.f32.vlgmr.msrb.gmra.mxu2 %vm692_vm2, %v685_v18 }
 0x170   :  { %834 = vmatmul.msk.f32.vlgmr.msrb.gmra.mxu3 %vm692_vm2, %v685_v18 }
 0x174   :  { %v618_v20 = vpop.f32.mrf.mxu0 }
 0x175   :  { %v638_v21 = vpop.f32.mrf.mxu1  ;;  %v619_v22 = vadd.f32 %v618_v20, %v582_v12 }
 0x176   :  { %v639_v23 = vadd.f32 %v638_v21, %v582_v12 }
 0x177   :  { %v681_v24 = vmax.f32 %v619_v22, 0.0 }
 0x178   :  { %v682_v25 = vmax.f32 %v639_v23, 0.0 }
 0x179   :  { %827 = vmatpush.msk.msrb.mxu0 %vm588_vm15, %v681_v24 }
 0x17a   :  { %829 = vmatpush.msk.msrb.mxu1 %vm588_vm15, %v682_v25  ;;  %828 = vmatmul.msk.f32.vlgmr.msrb.gmra.mxu0 %vm692_vm2, %v685_v18 }
 0x17b   :  { %830 = vmatmul.msk.f32.vlgmr.msrb.gmra.mxu1 %vm692_vm2, %v685_v18 }
 0x1f2   :  { %v765_v28 = vpop.f32.mrf.mxu2 }
 0x1f3   :  { %v785_v29 = vpop.f32.mrf.mxu3  ;;  %v766_v19 = vadd.f32 %v765_v28, %v690_v27 }
 0x1f4   :  { %v786_v30 = vadd.f32 %v785_v29, %v690_v27 }
 0x1f6   :  { %v793_v61 = vrot.slane %v786_v30, 4 }
 0x1f7   :  { %v725_v33 = vpop.f32.mrf.mxu0 }
 0x1f8   :  { %v745_v34 = vpop.f32.mrf.mxu1  ;;  %v795_v35 = vsel %vm588_vm15, %v766_v19, %v793_v61  ;;  %v726_v37 = vadd.f32 %v725_v33, %v690_v27 }
 0x1f9   :  { %v746_v36 = vadd.f32 %v745_v34, %v690_v27  ;;  %v799_v40 = vadd.f32 %v795_v35, %v944_v0 }
 0x1fb   :  { %v792_v41 = vrot.slane %v746_v36, 4  ;;  %801 = vst [vmem:[#allocation6 + $0x8] sm:$0xff] %v799_v40 }
 0x1fd   :  { %v794_v44 = vsel %vm588_vm15, %v726_v37, %v792_v41 }
 0x1fe   :  { %v798_v45 = vadd.f32 %v794_v44, %v946_v1 }
 0x200   :  { %800 = vst [vmem:[#allocation6] sm:$0xff] %v798_v45 }
 0x201   :  { %812 = dma.vmem_to_hbm [thread:$0]  %s808_s4, 256, %s810_s13, [#allocation5]  }
 0x202   :  { %898 = dma.done.wait [#allocation5], 256  }
 0x203   :  { %899 = vsyncadd [#allocation5], 4294967040 }
 0x204   :  { %817 = vsyncpa [#allocation4], 1 }
 0x205   :  { %818 = vsyncpa [#allocation5], 1 }

</bundles_post_ra>
